<compile_context>
chip_gen: v7x
topology: tpu7x:2x2x1
jax: 0.10.0
libtpu: 0.0.40
codegen_flags: <defaults>
</compile_context>

<pallas_src>
import functools

import jax
import jax.numpy as jnp
from jax.experimental import pallas as pl
from jax.experimental.pallas import tpu as pltpu

BN_EPS = 1e-5


def _round_up(x, m):
    return ((x + m - 1) // m) * m


def _pick_tile_n(n):
    """Batch tile: must span the full batch or be a multiple of 8 (output-block
    sublane rule).  Full batch is always legal and avoids any batch padding."""
    if n <= 64 or n % 8 != 0:
        return n
    for t in range(64, 7, -8):          # largest multiple-of-8 divisor <= 64
        if n % t == 0:
            return t
    return n


def top_kernel(x_ref, scale_ref, shift_ref, w_ref, b_ref, o_ref, acc_ref,
               *, hw_true, tile_hw, need_mask):
    # x_ref:     (tile_n, C, tile_hw)   NCHW-native activation tile (HW on lanes)
    # scale/shift: (1, C, 1)            folded BatchNorm scale / shift
    # w_ref:     (C, Kp)                classifier weight, 1/(H*W) pre-folded
    # b_ref:     (1, Kp)
    # o_ref:     (tile_n, Kp)           logits (resident across the HW axis)
    # acc_ref:   (tile_n, C) f32        running spatial sum
    hw_idx = pl.program_id(1)
    num_hw = pl.num_programs(1)

    @pl.when(hw_idx == 0)
    def _():
        acc_ref[...] = jnp.zeros_like(acc_ref)

    x = x_ref[...].astype(jnp.float32)                       # (tile_n, C, tile_hw)
    y = jnp.maximum(x * scale_ref[...] + shift_ref[...], 0.0)  # folded BN + ReLU

    if need_mask:
        # Only the last HW tile contains out-of-range (garbage) columns; only
        # it pays the mask.  Global column index, not tile-local.
        def _accum_masked():
            col = jax.lax.broadcasted_iota(jnp.int32, (1, 1, tile_hw), 2) \
                  + hw_idx * tile_hw
            acc_ref[...] += jnp.sum(jnp.where(col < hw_true, y, 0.0), axis=-1)

        def _accum_plain():
            acc_ref[...] += jnp.sum(y, axis=-1)

        pl.when(hw_idx == num_hw - 1)(_accum_masked)
        pl.when(hw_idx != num_hw - 1)(_accum_plain)
    else:
        acc_ref[...] += jnp.sum(y, axis=-1)                  # -> (tile_n, C)

    @pl.when(hw_idx == num_hw - 1)
    def _():
        # 1/(H*W) is folded into W in the wrapper; just matmul + bias.
        logits = jnp.dot(acc_ref[...], w_ref[...],
                         preferred_element_type=jnp.float32)
        o_ref[...] = (logits + b_ref[...]).astype(o_ref.dtype)


def top_forward(x_nchw, gamma, beta, running_mean, running_var, w, b, *, eps=BN_EPS):
    """x_nchw: (N, C, H, W).  w: (C, K), b: (K,).  Returns (N, K) logits."""
    N, C, H, W = x_nchw.shape
    K = w.shape[1]
    HW = H * W
    itemsize = jnp.dtype(x_nchw.dtype).itemsize

    # Fold BN (inference semantics) into per-channel scale & shift, once.
    scale = gamma * jax.lax.rsqrt(running_var.astype(jnp.float32) + eps)
    shift = beta - running_mean * scale
    scale_p = scale.astype(jnp.float32).reshape(1, C, 1)
    shift_p = shift.astype(jnp.float32).reshape(1, C, 1)

    # Classifier params: fold 1/(H*W) into W; pad only these tiny arrays to 128
    # lanes so the output store is lane-dense/unmasked.
    Kp = _round_up(K, 128)
    w_p = jnp.pad(w.astype(jnp.float32) * (1.0 / float(HW)), ((0, 0), (0, Kp - K)))
    b_p = jnp.pad(b.astype(jnp.float32), (0, Kp - K)).reshape(1, Kp)

    # NCHW-native, no HBM transpose / pad of the activation: free reshape only.
    x = x_nchw.reshape(N, C, HW)

    # Tiling. tile_n spans the full batch (small N) or a multiple-of-8 divisor.
    tile_n = _pick_tile_n(N)
    # x tile budget ~4 MiB: 2x-buffered it stays within every generation's
    # scoped-VMEM default and leaves ample headroom on v7x's 64 MiB physical.
    budget = 4 * 1024 * 1024
    per_col_bytes = tile_n * C * itemsize          # bytes per unit of HW in a tile
    if per_col_bytes * HW <= budget:
        tile_hw = HW                               # single HW step, no mask needed
    else:
        tile_hw = max(128, (budget // per_col_bytes) // 128 * 128)
    num_hw = pl.cdiv(HW, tile_hw)
    need_mask = (num_hw * tile_hw != HW)

    grid = (N // tile_n, num_hw)

    kernel = functools.partial(
        top_kernel, hw_true=HW, tile_hw=tile_hw, need_mask=need_mask)

    # Honest (unpadded-activation) traffic hint for XLA's scheduler.
    cost = pl.CostEstimate(
        flops=4 * N * C * HW + 2 * N * C * K,
        transcendentals=0,
        bytes_accessed=(x.size * itemsize + w_p.size * 4 + b_p.size * 4
                        + scale_p.size * 4 + shift_p.size * 4 + N * Kp * 4),
    )

    out = pl.pallas_call(
        kernel,
        out_shape=jax.ShapeDtypeStruct((N, Kp), jnp.float32),
        grid_spec=pltpu.PrefetchScalarGridSpec(
            num_scalar_prefetch=0,
            grid=grid,
            in_specs=[
                # x: tiled over (batch, HW); full channel extent (exempt from
                # the 128-lane rule since it equals the array dim).
                pl.BlockSpec((tile_n, C, tile_hw), lambda i, k: (i, 0, k)),
                # Small params: constant index_map -> DMA'd once, stay resident.
                pl.BlockSpec((1, C, 1), lambda i, k: (0, 0, 0)),
                pl.BlockSpec((1, C, 1), lambda i, k: (0, 0, 0)),
                pl.BlockSpec((C, Kp), lambda i, k: (0, 0)),
                pl.BlockSpec((1, Kp), lambda i, k: (0, 0)),
            ],
            out_specs=pl.BlockSpec((tile_n, Kp), lambda i, k: (i, 0)),
            scratch_shapes=[pltpu.VMEM((tile_n, C), jnp.float32)],
        ),
        compiler_params=pltpu.CompilerParams(
            dimension_semantics=("parallel", "arbitrary"),
            vmem_limit_bytes=32 * 1024 * 1024,
        ),
        cost_estimate=cost,
    )(x, scale_p, shift_p, w_p, b_p)

    return out[:, :K]


def reference_forward(x_nchw, gamma, beta, running_mean, running_var, w, b):
    inv_std = 1.0 / jnp.sqrt(running_var + BN_EPS)
    y = (x_nchw - running_mean[None, :, None, None]) * inv_std[None, :, None, None]
    y = y * gamma[None, :, None, None] + beta[None, :, None, None]
    y = jnp.maximum(y, 0.0)
    pooled = jnp.mean(y, axis=(2, 3))
    return pooled @ w + b[None, :]


if __name__ == "__main__":
    # Small, deterministic shapes consistent with the module's forward.
    N, C, H, W = 2, 8, 16, 16      # batch, in_dims (channels), spatial
    K = 10                         # num_classes

    key = jax.random.PRNGKey(0)
    kx, kg, kb, km, kv, kw, kbias = jax.random.split(key, 7)

    x = jax.random.normal(kx, (N, C, H, W), dtype=jnp.float32)

    # BatchNorm2d parameters + running stats (eval mode).
    gamma = jax.random.normal(kg, (C,), dtype=jnp.float32) * 0.1 + 1.0
    beta = jax.random.normal(kb, (C,), dtype=jnp.float32) * 0.1
    running_mean = jax.random.normal(km, (C,), dtype=jnp.float32) * 0.1
    running_var = jax.random.uniform(kv, (C,), dtype=jnp.float32, minval=0.5, maxval=1.5)

    # Linear(in_dims, num_classes): stored as (C, K) so kernel does pooled @ W.
    w = jax.random.normal(kw, (C, K), dtype=jnp.float32) * (1.0 / jnp.sqrt(C))
    b = jax.random.normal(kbias, (K,), dtype=jnp.float32) * 0.01

    out = top_forward(x, gamma, beta, running_mean, running_var, w, b)
    out = jax.block_until_ready(out)

    ref = reference_forward(x, gamma, beta, running_mean, running_var, w, b)
    assert out.shape == (N, K), out.shape
    assert jnp.allclose(out, ref, atol=1e-4, rtol=1e-4), (out, ref)

    print("KERNEL_OK")
</pallas_src>

<mosaic_0001>
module attributes {stable_mosaic.version = 11 : i64} {
  func.func @top_kernel(%arg0: i32, %arg1: i32, %arg2: memref<2x8x256xf32, #tpu.memory_space<vmem>>, %arg3: memref<1x8x1xf32, #tpu.memory_space<vmem>>, %arg4: memref<1x8x1xf32, #tpu.memory_space<vmem>>, %arg5: memref<8x128xf32, #tpu.memory_space<vmem>>, %arg6: memref<1x128xf32, #tpu.memory_space<vmem>>, %arg7: memref<2x128xf32, #tpu.memory_space<vmem>>, %arg8: memref<2x8xf32, #tpu.memory_space<vmem>>) attributes {dimension_semantics = [#tpu.dimension_semantics<parallel>, #tpu.dimension_semantics<arbitrary>], iteration_bounds = array<i64: 1, 1>, scalar_prefetch = 0 : i64, scratch_operands = 1 : i64, tpu.core_type = #tpu.core_type<tc>, window_params = [{transform_indices = @transform_0, window_bounds = array<i64: 2, 8, 256>}, {pipeline_mode = #tpu.pipeline_mode<synchronous>, transform_indices = @transform_1, window_bounds = array<i64: 1, 8, 1>}, {pipeline_mode = #tpu.pipeline_mode<synchronous>, transform_indices = @transform_2, window_bounds = array<i64: 1, 8, 1>}, {pipeline_mode = #tpu.pipeline_mode<synchronous>, transform_indices = @transform_3, window_bounds = array<i64: 8, 128>}, {pipeline_mode = #tpu.pipeline_mode<synchronous>, transform_indices = @transform_4, window_bounds = array<i64: 1, 128>}, {transform_indices = @transform_5, window_bounds = array<i64: 2, 128>}]} {
    %c0_i32 = arith.constant 0 : i32
    %0 = arith.cmpi eq, %arg1, %c0_i32 : i32
    %1 = arith.extui %0 : i1 to i32
    %c0_i32_0 = arith.constant 0 : i32
    %2 = arith.cmpi ne, %1, %c0_i32_0 : i32
    scf.if %2 {
      %cst_16 = arith.constant 0.000000e+00 : f32
      %19 = vector.broadcast %cst_16 : f32 to vector<2x8xf32>
      %c0_17 = arith.constant 0 : index
      %c0_18 = arith.constant 0 : index
      %20 = vector.load %arg8[%c0_17, %c0_18] : memref<2x8xf32, #tpu.memory_space<vmem>>, vector<2x8xf32>
      tpu.vector_store %arg8[%c0_17, %c0_18], %19 {strides = array<i32>} : memref<2x8xf32, #tpu.memory_space<vmem>>, vector<2x8xf32>,
    } else {
    }
    %c0 = arith.constant 0 : index
    %c0_1 = arith.constant 0 : index
    %c0_2 = arith.constant 0 : index
    %3 = vector.load %arg2[%c0, %c0_1, %c0_2] : memref<2x8x256xf32, #tpu.memory_space<vmem>>, vector<2x8x256xf32>
    %c0_3 = arith.constant 0 : index
    %c0_4 = arith.constant 0 : index
    %c0_5 = arith.constant 0 : index
    %4 = vector.load %arg3[%c0_3, %c0_4, %c0_5] : memref<1x8x1xf32, #tpu.memory_space<vmem>>, vector<1x8x1xf32>
    %5 = vector.broadcast %4 : vector<1x8x1xf32> to vector<2x8x256xf32>
    %6 = arith.mulf %3, %5 : vector<2x8x256xf32>
    %c0_6 = arith.constant 0 : index
    %c0_7 = arith.constant 0 : index
    %c0_8 = arith.constant 0 : index
    %7 = vector.load %arg4[%c0_6, %c0_7, %c0_8] : memref<1x8x1xf32, #tpu.memory_space<vmem>>, vector<1x8x1xf32>
    %8 = vector.broadcast %7 : vector<1x8x1xf32> to vector<2x8x256xf32>
    %9 = arith.addf %6, %8 : vector<2x8x256xf32>
    %cst = arith.constant 0.000000e+00 : f32
    %10 = vector.broadcast %cst : f32 to vector<2x8x256xf32>
    %11 = arith.maximumf %9, %10 : vector<2x8x256xf32>
    %c0_9 = arith.constant 0 : index
    %c0_10 = arith.constant 0 : index
    %12 = vector.load %arg8[%c0_9, %c0_10] : memref<2x8xf32, #tpu.memory_space<vmem>>, vector<2x8xf32>
    %cst_11 = arith.constant dense<0.000000e+00> : vector<2x8xf32>
    %13 = vector.multi_reduction <add>, %11, %cst_11 [2] : vector<2x8x256xf32> to vector<2x8xf32>
    %14 = arith.addf %12, %13 : vector<2x8xf32>
    %c0_12 = arith.constant 0 : index
    %c0_13 = arith.constant 0 : index
    %15 = vector.load %arg8[%c0_12, %c0_13] : memref<2x8xf32, #tpu.memory_space<vmem>>, vector<2x8xf32>
    tpu.vector_store %arg8[%c0_12, %c0_13], %14 {strides = array<i32>} : memref<2x8xf32, #tpu.memory_space<vmem>>, vector<2x8xf32>,
    %c0_i32_14 = arith.constant 0 : i32
    %16 = arith.cmpi eq, %arg1, %c0_i32_14 : i32
    %17 = arith.extui %16 : i1 to i32
    %c0_i32_15 = arith.constant 0 : i32
    %18 = arith.cmpi ne, %17, %c0_i32_15 : i32
    scf.if %18 {
      %c0_16 = arith.constant 0 : index
      %c0_17 = arith.constant 0 : index
      %19 = vector.load %arg8[%c0_16, %c0_17] : memref<2x8xf32, #tpu.memory_space<vmem>>, vector<2x8xf32>
      %c0_18 = arith.constant 0 : index
      %c0_19 = arith.constant 0 : index
      %20 = vector.load %arg5[%c0_18, %c0_19] : memref<8x128xf32, #tpu.memory_space<vmem>>, vector<8x128xf32>
      %cst_20 = arith.constant dense<0.000000e+00> : vector<2x128xf32>
      %21 = tpu.matmul %19, %20, %cst_20 {dimension_numbers = #tpu.dot_dimension_numbers<[1], [0], [0], [1], [0, 0, 1, 1], [], []>} : vector<2x8xf32>, vector<8x128xf32>, vector<2x128xf32> -> vector<2x128xf32>
      %c0_21 = arith.constant 0 : index
      %c0_22 = arith.constant 0 : index
      %22 = vector.load %arg6[%c0_21, %c0_22] : memref<1x128xf32, #tpu.memory_space<vmem>>, vector<1x128xf32>
      %23 = vector.broadcast %22 : vector<1x128xf32> to vector<2x128xf32>
      %24 = arith.addf %21, %23 : vector<2x128xf32>
      %c0_23 = arith.constant 0 : index
      %c0_24 = arith.constant 0 : index
      %25 = vector.load %arg7[%c0_23, %c0_24] : memref<2x128xf32, #tpu.memory_space<vmem>>, vector<2x128xf32>
      tpu.vector_store %arg7[%c0_23, %c0_24], %24 {strides = array<i32>} : memref<2x128xf32, #tpu.memory_space<vmem>>, vector<2x128xf32>,
    } else {
    }
    return
  }
  func.func @transform_0(%arg0: i32, %arg1: i32) -> (i32, i32, i32) {
    %c0_i32 = arith.constant 0 : i32
    %c0_i32_0 = arith.constant 0 : i32
    return %arg0, %c0_i32, %arg1 : i32, i32, i32
  }
  func.func @transform_1(%arg0: i32, %arg1: i32) -> (i32, i32, i32) {
    %c0_i32 = arith.constant 0 : i32
    %c0_i32_0 = arith.constant 0 : i32
    %c0_i32_1 = arith.constant 0 : i32
    %c0_i32_2 = arith.constant 0 : i32
    return %c0_i32, %c0_i32_0, %c0_i32_1 : i32, i32, i32
  }
  func.func @transform_2(%arg0: i32, %arg1: i32) -> (i32, i32, i32) {
    %c0_i32 = arith.constant 0 : i32
    %c0_i32_0 = arith.constant 0 : i32
    %c0_i32_1 = arith.constant 0 : i32
    %c0_i32_2 = arith.constant 0 : i32
    return %c0_i32, %c0_i32_0, %c0_i32_1 : i32, i32, i32
  }
  func.func @transform_3(%arg0: i32, %arg1: i32) -> (i32, i32) {
    %c0_i32 = arith.constant 0 : i32
    %c0_i32_0 = arith.constant 0 : i32
    %c0_i32_1 = arith.constant 0 : i32
    return %c0_i32, %c0_i32_0 : i32, i32
  }
  func.func @transform_4(%arg0: i32, %arg1: i32) -> (i32, i32) {
    %c0_i32 = arith.constant 0 : i32
    %c0_i32_0 = arith.constant 0 : i32
    %c0_i32_1 = arith.constant 0 : i32
    return %c0_i32, %c0_i32_0 : i32, i32
  }
  func.func @transform_5(%arg0: i32, %arg1: i32) -> (i32, i32) {
    %c0_i32 = arith.constant 0 : i32
    %c0_i32_0 = arith.constant 0 : i32
    return %arg0, %c0_i32 : i32, i32
  }
}

</mosaic_0001>

<bundles_post_ra>
// kernel: tpu_custom_call.1
= control target key start
LH: loop header
LB: loop body
LE: loop exit
PB: predicated region body
PF: predicated region fallthrough
CT: control target
= control target key end

     0   :  { %10 = vsyncpa [#allocation4], 0  ;;  %s336_s0 = inlined_call_operand.hbm [shape: f32[2,8,256], index: 0, kind: input, shape index: {}]   ;;  %s337_s1 = inlined_call_operand.vmem [shape: f32[1,8,1], index: 1, kind: input, shape index: {}]   ;;  %s338_s2 = inlined_call_operand.vmem [shape: f32[1,8,1], index: 2, kind: input, shape index: {}]   ;;  %s339_s3 = inlined_call_operand.vmem [shape: f32[8,128], index: 3, kind: input, shape index: {}]   ;;  %s340_s4 = inlined_call_operand.vmem [shape: f32[1,128], index: 4, kind: input, shape index: {}]   ;;  %s341_s5 = inlined_call_operand.hbm [shape: f32[2,128], index: 5, kind: output, shape index: {}]  }
   0x1   :  { %11 = vsyncpa [#allocation5], 0  ;;  %s261_s18 = smov [#allocation3]   ;;  %s213_s22 = scalar_lea.hbm %s336_s0, 512 }
   0x2   :  { %s17_s19 = sshll.u32 %s261_s18, 4  ;;  %p214_p0 = scmp.ne.s32.totalorder %s336_s0, %s213_s22  ;;  %s18_s19 = int_to_ptr.vmem [resolvable:$true] %s17_s19 }
   0x3   :  { %p217_p1 = scmp.lt.u32.totalorder %s213_s22, %s336_s0 }
   0x5   :  { %p219_p2 = pnand %p217_p1, %p214_p0 }
   0x7   :  { %222 = shalt.err (!%p219_p2)
}
   0x8   :  { %s223_s27 = scalar_lea.vmem %s18_s19, 512  ;;  %p228_p4 = scmp.lt.s32.totalorder %s18_s19, %s18_s19 }
   0x9   :  { %p224_p3 = scmp.ne.s32.totalorder %s18_s19, %s223_s27  ;;  %p229_p5 = scmp.lt.s32.totalorder %s223_s27, %s223_s27 }
   0xb   :  { %p230_p6 = por %p229_p5, %p228_p4 }
   0xd   :  { %p231_p7 = pnand %p230_p6, %p224_p3 }
   0xf   :  { %234 = shalt.err (!%p231_p7)
}
  0x10   :  { %s262_s28 = smov 256   ;;  %s263_s29 = smov 16  }
  0x11   :  { %23 = dma.hbm_to_vmem [thread:$0]  %s336_s0, 512, %s18_s19, [#allocation4], %s262_s28, %s262_s28, %s263_s29  }
  0x12   :  { %257 = dma.done.wait [#allocation4], 512  }
  0x13   :  { %258 = vsyncadd [#allocation4], 4294966784  ;;  %v264_v0 = vmov 0   ;;  %v45_v1 = vld [vmem:[%s337_s1] sm:$0xff]  ;;  %v43_v3 = vld [vmem:[#allocation3 + $0x10] sm:$0xff]  ;;  %vm39_vm0 = vcmask 58368   ;;  %v78_v25 = vlaneseq }
  0x14   :  { %212 = vset.pattern.permute.xlu0 %v264_v0  ;;  %v55_v2 = vld [vmem:[%s338_s2] sm:$0xff]  ;;  %v42_v7 = vld [vmem:[#allocation3 + $0x8] sm:$0xff]  ;;  %v265_v23 = vmov 0.0   ;;  %vm266_vm1 = vmmov 0   ;;  %vm88_vm2 = vcmask 1041409   ;;  %vm106_vm3 = vcmask 64512  }
  0x15   :  { %48 = vperm.xlu0 %212, %v45_v1   ;;  %v44_v5 = vld [vmem:[#allocation3 + $0x18] sm:$0xff]  ;;  %v41_v6 = vld [vmem:[#allocation3] sm:$0xff]  ;;  %40 = vst.msk [vmem:[#allocation2] sm:$0x3] %vm39_vm0, %v265_v23  ;;  %200 = vmatprep.subr.mxu0 %v265_v23  ;;  %v79_v26 = vand.u32 127, %v78_v25  ;;  %v81_v27 = vshrl.u32 %v78_v25, 7 }
  0x16   :  { %v98_v24 = vld [vmem:[%s339_s3] sm:$0xff]  ;;  %202 = vmatprep.mubr.msk.f32.mxu0 %vm266_vm1, %v265_v23  ;;  %s267_s11 = smov [#allocation6]  }
  0x17   :  { %201 = vmatpush3.msra.mxu0 %v98_v24  ;;  %v82_v29 = vsub.s32 %v79_v26, %v81_v27  ;;  %v196_v37 = vld [vmem:[%s340_s4] ss:$0 sm:$0xff]  ;;  %s187_s12 = sshll.u32 %s267_s11, 4  ;;  %s188_s12 = int_to_ptr.vmem [resolvable:$true] %s187_s12 }
  0x18   :  { %s235_s13 = scalar_lea.vmem %s188_s12, 32  ;;  %p240_p9 = scmp.lt.s32.totalorder %s188_s12, %s188_s12 }
  0x19   :  { %58 = vperm.xlu0 %212, %v55_v2   ;;  %p236_p8 = scmp.ne.s32.totalorder %s188_s12, %s235_s13  ;;  %p241_p10 = scmp.lt.s32.totalorder %s235_s13, %s235_s13 }
  0x1b   :  { %p242_p11 = por %p241_p10, %p240_p9 }
  0x1c   :  { %v69_v33 = vld [vmem:[#allocation2] sm:$0x3] }
  0x1d   :  { %p243_p12 = pnand %p242_p11, %p236_p8 }
  0x94   :  { %v49_v4 = vpop.permute.xlu0 %48 }
  0x95   :  { %v53_v8 = vmul.f32 %v49_v4, %v43_v3  ;;  %v54_v9 = vmul.f32 %v49_v4, %v44_v5  ;;  %v51_v10 = vmul.f32 %v49_v4, %v41_v6  ;;  %v52_v11 = vmul.f32 %v49_v4, %v42_v7 }
  0x98   :  { %v59_v12 = vpop.permute.xlu0 %58 }
  0x99   :  { %v63_v13 = vadd.f32 %v59_v12, %v53_v8  ;;  %v64_v14 = vadd.f32 %v59_v12, %v54_v9  ;;  %v61_v15 = vadd.f32 %v59_v12, %v51_v10  ;;  %v62_v16 = vadd.f32 %v59_v12, %v52_v11 }
  0x9b   :  { %v65_v17 = vmax.f32 %v61_v15, 0.0  ;;  %v66_v18 = vmax.f32 %v62_v16, 0.0  ;;  %v67_v20 = vmax.f32 %v63_v13, 0.0  ;;  %v68_v21 = vmax.f32 %v64_v14, 0.0 }
  0x9d   :  { %v70_v19 = vadd.f32 %v66_v18, %v65_v17  ;;  %v73_v22 = vadd.f32 %v68_v21, %v67_v20 }
  0x9f   :  { %71 = vadd.xlane.f32.xlu1 %v70_v19 }
  0xa3   :  { %74 = vadd.xlane.f32.xlu1 %v73_v22 }
 0x12c   :  { %v72_v28 = vpop.xlane.xlu1 %71 }
 0x12d   :  { %v83_v31 = vrot.slane %v72_v28, %v82_v29 }
 0x130   :  { %v75_v30 = vpop.xlane.xlu1 %74 }
 0x131   :  { %v87_v32 = vrot.slane %v75_v30, %v82_v29 }
 0x133   :  { %v89_v34 = vsel %vm88_vm2, %v87_v32, %v83_v31 }
 0x134   :  { %v91_v35 = vadd.f32 %v89_v34, %v69_v33 }
 0x136   :  { %93 = vst.msk [vmem:[#allocation2] sm:$0x3] %vm39_vm0, %v91_v35 }
 0x13d   :  { %v97_v36 = vld [vmem:[#allocation2] sm:$0x3] }
 0x13e   :  { %203 = vmatmul.mubr.msk.f32.vlgmr.msra.gmra.mrb[0].mxu0 %vm106_vm3, %v97_v36 }
 0x211   :  { %v176_v38 = vpop.f32.mrb[0].mxu0 }
 0x212   :  { %v177_v39 = vadd.f32 %v196_v37, %v176_v38  ;;  %v204_v40 = vpop.f32.mrb[1].mxu0 }
 0x214   :  { %180 = vst [vmem:[#allocation6] sm:$0x3] %v177_v39 }
 0x215   :  { %246 = shalt.err (!%p243_p12)
}
 0x216   :  { %s247_s16 = scalar_lea.hbm %s341_s5, 32 }
 0x217   :  { %p248_p13 = scmp.ne.s32.totalorder %s341_s5, %s247_s16  ;;  %p251_p0 = scmp.lt.u32.totalorder %s247_s16, %s341_s5 }
 0x219   :  { %p253_p1 = pnand %p251_p0, %p248_p13 }
 0x21b   :  { %256 = shalt.err (!%p253_p1)
}
 0x21c   :  { %190 = dma.vmem_to_hbm [thread:$0]  %s188_s12, 32, %s341_s5, [#allocation5]  }
 0x21d   :  { %259 = dma.done.wait [#allocation5], 32  }
 0x21e   :  { %260 = vsyncadd [#allocation5], 4294967264 }
 0x21f   :  { %194 = vsyncpa [#allocation4], 1 }
 0x220   :  { %195 = vsyncpa [#allocation5], 1 }

</bundles_post_ra>
